<compile_context>
chip_gen: v5e
topology: v5e:2x2
jax: 0.10.0
libtpu: 0.0.40
codegen_flags: <defaults>
</compile_context>

<pallas_src>
import functools
import math

import jax
import jax.numpy as jnp
from jax import lax
from jax.experimental import pallas as pl
from jax.experimental.pallas import tpu as pltpu


def petri_embedding_kernel(seq_ref, seg_ref, coords_ref, table_ref, pe_ref, w3t_ref,
                           lnw_ref, lnb_ref, out_ref, *, vocab_size):
    S, E = pe_ref.shape
    half = E // 2
    Vpad = table_ref.shape[0]

    # --- Fused Token + Segment embedding: one "two-hot" MXU matmul over the stacked,
    #     128-padded table. Segment rows live at [vocab_size, vocab_size + 3). ---
    ids = seq_ref[0]                                          # (S, 1) int32
    sids = seg_ref[0] + vocab_size                            # (S, 1) int32, offset into stacked table
    col = lax.broadcasted_iota(jnp.int32, (S, Vpad), 1)
    two_hot = ((col == ids) | (col == sids)).astype(jnp.float32)      # (S, Vpad)
    tok_seg = jnp.dot(two_hot, table_ref[...],
                      preferred_element_type=jnp.float32)             # (S, E) = tok[ids] + seg[sids]

    # --- PostionalEmbedding3D: linear(3 -> E/2, no bias) as three exact-f32 VPU broadcast-FMAs
    #     (K=3 is far too small for the MXU), then cos/sin feed the two halves directly. ---
    c = coords_ref[0]                                         # (S, 3)
    w = w3t_ref[...]                                          # (3, E/2)
    e_half = (c[:, 0:1] * w[0:1, :]
              + c[:, 1:2] * w[1:2, :]
              + c[:, 2:3] * w[2:3, :])                        # (S, E/2)

    # --- sum of embeddings, kept as two (S, E/2) halves: no concatenate, fewer live slabs. ---
    x_lo = tok_seg[:, :half] + pe_ref[:, :half] + jnp.cos(e_half)
    x_hi = tok_seg[:, half:] + pe_ref[:, half:] + jnp.sin(e_half)

    # --- LayerNorm over normalized_shape=(seq_len, embed_size), eps=1e-5.
    #     Single traversal: sum and sum-of-squares in f32. (Embeddings here are ~zero-mean, so
    #     the E[x^2] - mean^2 form is well conditioned; use a shifted two-pass form otherwise.) ---
    inv_n = 1.0 / (S * E)
    total = jnp.sum(x_lo) + jnp.sum(x_hi)
    total_sq = jnp.sum(x_lo * x_lo) + jnp.sum(x_hi * x_hi)
    mean = total * inv_n
    var = total_sq * inv_n - mean * mean
    inv_std = lax.rsqrt(var + 1e-5)

    # Dropout(p=0.1) is identity at inference.
    out_ref[0, :, :half] = (x_lo - mean) * inv_std * lnw_ref[:, :half] + lnb_ref[:, :half]
    out_ref[0, :, half:] = (x_hi - mean) * inv_std * lnw_ref[:, half:] + lnb_ref[:, half:]


def petri_embedding(seqs, coords, segment_label, tok_table, seg_table, pe, w3_t, ln_w, ln_b):
    """seqs/segment_label: (B,S,1) int32; coords: (B,S,3) f32; returns (B,S,E) f32."""
    B, S, _ = seqs.shape
    V, E = tok_table.shape
    NSEG = seg_table.shape[0]
    half = E // 2

    # Stack segment table under the token table and zero-pad K up to a multiple of 128 so the
    # single gather-matmul has a lane-aligned contraction depth.
    Vpad = 128 * ((V + NSEG + 127) // 128)
    table = jnp.zeros((Vpad, E), jnp.float32)
    table = table.at[:V].set(tok_table.astype(jnp.float32))
    table = table.at[V:V + NSEG].set(seg_table.astype(jnp.float32))

    kernel = functools.partial(petri_embedding_kernel, vocab_size=V)

    const_map = lambda b: (0, 0)
    single = pl.Buffered(1)          # grid-invariant inputs: no need to double-buffer in VMEM

    grid_spec = pltpu.PrefetchScalarGridSpec(
        num_scalar_prefetch=0,
        grid=(B,),
        in_specs=[
            pl.BlockSpec((1, S, 1), lambda b: (b, 0, 0)),                          # seqs
            pl.BlockSpec((1, S, 1), lambda b: (b, 0, 0)),                          # segment_label
            pl.BlockSpec((1, S, 3), lambda b: (b, 0, 0)),                          # coords
            pl.BlockSpec((Vpad, E), const_map, pipeline_mode=single),              # fused tok+seg table
            pl.BlockSpec((S, E), const_map, pipeline_mode=single),                 # sinusoidal PE
            pl.BlockSpec((3, half), const_map, pipeline_mode=single),              # linear weight (3, E/2)
            pl.BlockSpec((S, E), const_map, pipeline_mode=single),                 # LayerNorm weight
            pl.BlockSpec((S, E), const_map, pipeline_mode=single),                 # LayerNorm bias
        ],
        out_specs=pl.BlockSpec((1, S, E), lambda b: (b, 0, 0)),
    )

    cost = pl.CostEstimate(
        flops=B * (2 * S * Vpad * E + 6 * S * half + 10 * S * E),
        transcendentals=B * (S * E + 1),                     # cos/sin halves + rsqrt per batch
        bytes_accessed=(B * S * E * 4                        # output write
                        + B * S * (1 + 1 + 3) * 4            # per-batch ids / coords
                        + (Vpad * E + 3 * S * E + 3 * half) * 4),   # resident tables/constants
    )

    return pl.pallas_call(
        kernel,
        out_shape=jax.ShapeDtypeStruct((B, S, E), jnp.float32),
        grid_spec=grid_spec,
        compiler_params=pltpu.CompilerParams(dimension_semantics=("parallel",)),
        cost_estimate=cost,
    )(seqs, segment_label, coords, table, pe, w3_t, ln_w, ln_b)


def make_sinusoidal_pe(seq_len, d_model):
    position = jnp.arange(seq_len, dtype=jnp.float32)[:, None]                       # (S, 1)
    div_term = jnp.exp(jnp.arange(0, d_model, 2, dtype=jnp.float32)
                       * -(math.log(10000.0) / d_model))                             # (E/2,)
    pe = jnp.zeros((seq_len, d_model), jnp.float32)
    pe = pe.at[:, 0::2].set(jnp.sin(position * div_term))
    pe = pe.at[:, 1::2].set(jnp.cos(position * div_term))
    return pe


def reference_forward(seqs, coords, segment_label, tok_table, seg_table, pe, w3_t, ln_w, ln_b):
    ids = seqs[..., 0]
    sids = segment_label[..., 0]
    x = tok_table[ids]                                        # token embedding  (B, S, E)
    x = x + pe[None]                                          # sinusoidal PE
    # Exact-f32 linear(3 -> E/2) to mirror PyTorch's f32 nn.Linear (no bf16 matmul truncation).
    e = (coords[..., :, None] * w3_t[None, None, :, :]).sum(axis=-2)   # (B, S, E/2)
    x = x + jnp.concatenate([jnp.cos(e), jnp.sin(e)], -1)     # 3D positional embedding
    x = x + seg_table[sids]                                   # segment embedding
    mean = x.mean(axis=(1, 2), keepdims=True)
    var = ((x - mean) ** 2).mean(axis=(1, 2), keepdims=True)
    x = (x - mean) / jnp.sqrt(var + 1e-5)
    return x * ln_w[None] + ln_b[None]


if __name__ == "__main__":
    B, S, E, V = 2, 8, 32, 16                                 # batch, seq_len, embed_size, vocab_size

    key = jax.random.PRNGKey(0)
    k_seq, k_seg, k_crd, k_tok, k_segt, k_w3, k_lnw, k_lnb = jax.random.split(key, 8)

    seqs = jax.random.randint(k_seq, (B, S, 1), 0, V, dtype=jnp.int32)
    segment_label = jax.random.randint(k_seg, (B, S, 1), 0, 3, dtype=jnp.int32)
    coords = jax.random.normal(k_crd, (B, S, 3), jnp.float32)

    # nn.Embedding default init N(0,1); padding_idx=2 -> row 2 zeroed.
    tok_table = jax.random.normal(k_tok, (V, E), jnp.float32).at[2].set(0.0)
    seg_table = jax.random.normal(k_segt, (3, E), jnp.float32).at[2].set(0.0)

    # PostionalEmbedding3D linear weight: uniform(0, 1), shape (E/2, 3); pass pre-transposed.
    w3 = jax.random.uniform(k_w3, (E // 2, 3), jnp.float32, 0.0, 1.0)
    w3_t = w3.T                                               # (3, E/2)

    # LayerNorm affine params over normalized_shape (S, E). (Defaults are ones/zeros;
    # use deterministic random values so the affine path is exercised.)
    ln_w = 1.0 + 0.1 * jax.random.normal(k_lnw, (S, E), jnp.float32)
    ln_b = 0.1 * jax.random.normal(k_lnb, (S, E), jnp.float32)

    pe = make_sinusoidal_pe(S, E)

    out = petri_embedding(seqs, coords, segment_label, tok_table, seg_table, pe, w3_t, ln_w, ln_b)
    out = jax.block_until_ready(out)

    ref = reference_forward(seqs, coords, segment_label, tok_table, seg_table, pe, w3_t, ln_w, ln_b)
    assert out.shape == (B, S, E)
    assert jnp.allclose(out, ref, atol=1e-4, rtol=1e-4), float(jnp.max(jnp.abs(out - ref)))

    print("KERNEL_OK")
</pallas_src>

<mosaic_0001>
module attributes {stable_mosaic.version = 11 : i64} {
  func.func @petri_embedding_kernel(%arg0: i32, %arg1: memref<1x8x1xi32, #tpu.memory_space<vmem>>, %arg2: memref<1x8x1xi32, #tpu.memory_space<vmem>>, %arg3: memref<1x8x3xf32, #tpu.memory_space<vmem>>, %arg4: memref<128x32xf32, #tpu.memory_space<vmem>>, %arg5: memref<8x32xf32, #tpu.memory_space<vmem>>, %arg6: memref<3x16xf32, #tpu.memory_space<vmem>>, %arg7: memref<8x32xf32, #tpu.memory_space<vmem>>, %arg8: memref<8x32xf32, #tpu.memory_space<vmem>>, %arg9: memref<1x8x32xf32, #tpu.memory_space<vmem>>) attributes {dimension_semantics = [#tpu.dimension_semantics<parallel>], iteration_bounds = array<i64: 2>, scalar_prefetch = 0 : i64, scratch_operands = 0 : i64, tpu.core_type = #tpu.core_type<tc>, window_params = [{transform_indices = @transform_0, window_bounds = array<i64: 1, 8, 1>}, {transform_indices = @transform_1, window_bounds = array<i64: 1, 8, 1>}, {transform_indices = @transform_2, window_bounds = array<i64: 1, 8, 3>}, {pipeline_mode = #tpu.pipeline_mode<synchronous>, transform_indices = @transform_3, window_bounds = array<i64: 128, 32>}, {pipeline_mode = #tpu.pipeline_mode<synchronous>, transform_indices = @transform_4, window_bounds = array<i64: 8, 32>}, {pipeline_mode = #tpu.pipeline_mode<synchronous>, transform_indices = @transform_5, window_bounds = array<i64: 3, 16>}, {pipeline_mode = #tpu.pipeline_mode<synchronous>, transform_indices = @transform_6, window_bounds = array<i64: 8, 32>}, {pipeline_mode = #tpu.pipeline_mode<synchronous>, transform_indices = @transform_7, window_bounds = array<i64: 8, 32>}, {transform_indices = @transform_8, window_bounds = array<i64: 1, 8, 32>}]} {
    %c0 = arith.constant 0 : index
    %c0_0 = arith.constant 0 : index
    %c0_1 = arith.constant 0 : index
    %0 = vector.load %arg1[%c0, %c0_0, %c0_1] : memref<1x8x1xi32, #tpu.memory_space<vmem>>, vector<1x8x1xi32>
    %1 = vector.shape_cast %0 : vector<1x8x1xi32> to vector<8x1xi32>
    %c0_2 = arith.constant 0 : index
    %c0_3 = arith.constant 0 : index
    %c0_4 = arith.constant 0 : index
    %2 = vector.load %arg2[%c0_2, %c0_3, %c0_4] : memref<1x8x1xi32, #tpu.memory_space<vmem>>, vector<1x8x1xi32>
    %3 = vector.shape_cast %2 : vector<1x8x1xi32> to vector<8x1xi32>
    %c16_i32 = arith.constant 16 : i32
    %4 = vector.broadcast %c16_i32 : i32 to vector<8x1xi32>
    %5 = arith.addi %3, %4 : vector<8x1xi32>
    %6 = tpu.iota {dimensions = array<i32: 1>} : vector<8x128xi32>
    %7 = vector.broadcast %1 : vector<8x1xi32> to vector<8x128xi32>
    %8 = arith.cmpi eq, %6, %7 : vector<8x128xi32>
    %9 = vector.broadcast %5 : vector<8x1xi32> to vector<8x128xi32>
    %10 = arith.cmpi eq, %6, %9 : vector<8x128xi32>
    %11 = arith.ori %8, %10 : vector<8x128xi1>
    %12 = arith.extui %11 : vector<8x128xi1> to vector<8x128xi32>
    %13 = arith.sitofp %12 : vector<8x128xi32> to vector<8x128xf32>
    %c0_5 = arith.constant 0 : index
    %c0_6 = arith.constant 0 : index
    %14 = vector.load %arg4[%c0_5, %c0_6] : memref<128x32xf32, #tpu.memory_space<vmem>>, vector<128x32xf32>
    %cst = arith.constant dense<0.000000e+00> : vector<8x32xf32>
    %15 = tpu.matmul %13, %14, %cst {dimension_numbers = #tpu.dot_dimension_numbers<[1], [0], [0], [1], [0, 0, 1, 1], [], []>} : vector<8x128xf32>, vector<128x32xf32>, vector<8x32xf32> -> vector<8x32xf32>
    %c0_7 = arith.constant 0 : index
    %c0_8 = arith.constant 0 : index
    %c0_9 = arith.constant 0 : index
    %16 = vector.load %arg3[%c0_7, %c0_8, %c0_9] : memref<1x8x3xf32, #tpu.memory_space<vmem>>, vector<1x8x3xf32>
    %17 = vector.shape_cast %16 : vector<1x8x3xf32> to vector<8x3xf32>
    %c0_10 = arith.constant 0 : index
    %c0_11 = arith.constant 0 : index
    %18 = vector.load %arg6[%c0_10, %c0_11] : memref<3x16xf32, #tpu.memory_space<vmem>>, vector<3x16xf32>
    %19 = vector.extract_strided_slice %17 {offsets = [0, 0], sizes = [8, 1], strides = [1, 1]} : vector<8x3xf32> to vector<8x1xf32>
    %20 = vector.extract_strided_slice %18 {offsets = [0, 0], sizes = [1, 16], strides = [1, 1]} : vector<3x16xf32> to vector<1x16xf32>
    %21 = vector.broadcast %19 : vector<8x1xf32> to vector<8x16xf32>
    %22 = vector.broadcast %20 : vector<1x16xf32> to vector<8x16xf32>
    %23 = arith.mulf %21, %22 : vector<8x16xf32>
    %24 = vector.extract_strided_slice %17 {offsets = [0, 1], sizes = [8, 1], strides = [1, 1]} : vector<8x3xf32> to vector<8x1xf32>
    %25 = vector.extract_strided_slice %18 {offsets = [1, 0], sizes = [1, 16], strides = [1, 1]} : vector<3x16xf32> to vector<1x16xf32>
    %26 = vector.broadcast %24 : vector<8x1xf32> to vector<8x16xf32>
    %27 = vector.broadcast %25 : vector<1x16xf32> to vector<8x16xf32>
    %28 = arith.mulf %26, %27 : vector<8x16xf32>
    %29 = arith.addf %23, %28 : vector<8x16xf32>
    %30 = vector.extract_strided_slice %17 {offsets = [0, 2], sizes = [8, 1], strides = [1, 1]} : vector<8x3xf32> to vector<8x1xf32>
    %31 = vector.extract_strided_slice %18 {offsets = [2, 0], sizes = [1, 16], strides = [1, 1]} : vector<3x16xf32> to vector<1x16xf32>
    %32 = vector.broadcast %30 : vector<8x1xf32> to vector<8x16xf32>
    %33 = vector.broadcast %31 : vector<1x16xf32> to vector<8x16xf32>
    %34 = arith.mulf %32, %33 : vector<8x16xf32>
    %35 = arith.addf %29, %34 : vector<8x16xf32>
    %36 = vector.extract_strided_slice %15 {offsets = [0, 0], sizes = [8, 16], strides = [1, 1]} : vector<8x32xf32> to vector<8x16xf32>
    %c0_12 = arith.constant 0 : index
    %c0_13 = arith.constant 0 : index
    %37 = vector.load %arg5[%c0_12, %c0_13] : memref<8x32xf32, #tpu.memory_space<vmem>>, vector<8x16xf32>
    %38 = arith.addf %36, %37 : vector<8x16xf32>
    %39 = math.cos %35 : vector<8x16xf32>
    %40 = arith.addf %38, %39 : vector<8x16xf32>
    %41 = vector.extract_strided_slice %15 {offsets = [0, 16], sizes = [8, 16], strides = [1, 1]} : vector<8x32xf32> to vector<8x16xf32>
    %c0_14 = arith.constant 0 : index
    %c16 = arith.constant 16 : index
    %42 = vector.load %arg5[%c0_14, %c16] : memref<8x32xf32, #tpu.memory_space<vmem>>, vector<8x16xf32>
    %43 = arith.addf %41, %42 : vector<8x16xf32>
    %44 = math.sin %35 : vector<8x16xf32>
    %45 = arith.addf %43, %44 : vector<8x16xf32>
    %46 = vector.shape_cast %40 : vector<8x16xf32> to vector<1x8x16xf32>
    %cst_15 = arith.constant dense<0.000000e+00> : vector<1xf32>
    %47 = vector.multi_reduction <add>, %46, %cst_15 [1, 2] : vector<1x8x16xf32> to vector<1xf32>
    %48 = vector.shape_cast %47 : vector<1xf32> to vector<1x1x1xf32>
    %49 = vector.extract %48[0, 0, 0] : f32 from vector<1x1x1xf32>
    %50 = vector.shape_cast %45 : vector<8x16xf32> to vector<1x8x16xf32>
    %cst_16 = arith.constant dense<0.000000e+00> : vector<1xf32>
    %51 = vector.multi_reduction <add>, %50, %cst_16 [1, 2] : vector<1x8x16xf32> to vector<1xf32>
    %52 = vector.shape_cast %51 : vector<1xf32> to vector<1x1x1xf32>
    %53 = vector.extract %52[0, 0, 0] : f32 from vector<1x1x1xf32>
    %54 = arith.addf %49, %53 : f32
    %55 = arith.mulf %40, %40 : vector<8x16xf32>
    %56 = vector.shape_cast %55 : vector<8x16xf32> to vector<1x8x16xf32>
    %cst_17 = arith.constant dense<0.000000e+00> : vector<1xf32>
    %57 = vector.multi_reduction <add>, %56, %cst_17 [1, 2] : vector<1x8x16xf32> to vector<1xf32>
    %58 = vector.shape_cast %57 : vector<1xf32> to vector<1x1x1xf32>
    %59 = vector.extract %58[0, 0, 0] : f32 from vector<1x1x1xf32>
    %60 = arith.mulf %45, %45 : vector<8x16xf32>
    %61 = vector.shape_cast %60 : vector<8x16xf32> to vector<1x8x16xf32>
    %cst_18 = arith.constant dense<0.000000e+00> : vector<1xf32>
    %62 = vector.multi_reduction <add>, %61, %cst_18 [1, 2] : vector<1x8x16xf32> to vector<1xf32>
    %63 = vector.shape_cast %62 : vector<1xf32> to vector<1x1x1xf32>
    %64 = vector.extract %63[0, 0, 0] : f32 from vector<1x1x1xf32>
    %65 = arith.addf %59, %64 : f32
    %cst_19 = arith.constant 3.906250e-03 : f32
    %66 = arith.mulf %54, %cst_19 : f32
    %cst_20 = arith.constant 3.906250e-03 : f32
    %67 = arith.mulf %65, %cst_20 : f32
    %68 = arith.mulf %66, %66 : f32
    %69 = arith.subf %67, %68 : f32
    %cst_21 = arith.constant 9.99999974E-6 : f32
    %70 = arith.addf %69, %cst_21 : f32
    %71 = math.rsqrt %70 : f32
    %72 = vector.broadcast %66 : f32 to vector<8x16xf32>
    %73 = arith.subf %40, %72 : vector<8x16xf32>
    %74 = vector.broadcast %71 : f32 to vector<8x16xf32>
    %75 = arith.mulf %73, %74 : vector<8x16xf32>
    %c0_22 = arith.constant 0 : index
    %c0_23 = arith.constant 0 : index
    %76 = vector.load %arg7[%c0_22, %c0_23] : memref<8x32xf32, #tpu.memory_space<vmem>>, vector<8x16xf32>
    %77 = arith.mulf %75, %76 : vector<8x16xf32>
    %c0_24 = arith.constant 0 : index
    %c0_25 = arith.constant 0 : index
    %78 = vector.load %arg8[%c0_24, %c0_25] : memref<8x32xf32, #tpu.memory_space<vmem>>, vector<8x16xf32>
    %79 = arith.addf %77, %78 : vector<8x16xf32>
    %c0_26 = arith.constant 0 : index
    %c0_27 = arith.constant 0 : index
    %c0_28 = arith.constant 0 : index
    %80 = vector.load %arg9[%c0_26, %c0_27, %c0_28] : memref<1x8x32xf32, #tpu.memory_space<vmem>>, vector<1x8x16xf32>
    %81 = vector.shape_cast %80 : vector<1x8x16xf32> to vector<8x16xf32>
    %82 = vector.shape_cast %79 : vector<8x16xf32> to vector<1x8x16xf32>
    tpu.vector_store %arg9[%c0_26, %c0_27, %c0_28], %82 {strides = array<i32>} : memref<1x8x32xf32, #tpu.memory_space<vmem>>, vector<1x8x16xf32>,
    %83 = vector.broadcast %66 : f32 to vector<8x16xf32>
    %84 = arith.subf %45, %83 : vector<8x16xf32>
    %85 = vector.broadcast %71 : f32 to vector<8x16xf32>
    %86 = arith.mulf %84, %85 : vector<8x16xf32>
    %c0_29 = arith.constant 0 : index
    %c16_30 = arith.constant 16 : index
    %87 = vector.load %arg7[%c0_29, %c16_30] : memref<8x32xf32, #tpu.memory_space<vmem>>, vector<8x16xf32>
    %88 = arith.mulf %86, %87 : vector<8x16xf32>
    %c0_31 = arith.constant 0 : index
    %c16_32 = arith.constant 16 : index
    %89 = vector.load %arg8[%c0_31, %c16_32] : memref<8x32xf32, #tpu.memory_space<vmem>>, vector<8x16xf32>
    %90 = arith.addf %88, %89 : vector<8x16xf32>
    %c0_33 = arith.constant 0 : index
    %c0_34 = arith.constant 0 : index
    %c16_35 = arith.constant 16 : index
    %91 = vector.load %arg9[%c0_33, %c0_34, %c16_35] : memref<1x8x32xf32, #tpu.memory_space<vmem>>, vector<1x8x16xf32>
    %92 = vector.shape_cast %91 : vector<1x8x16xf32> to vector<8x16xf32>
    %93 = vector.shape_cast %90 : vector<8x16xf32> to vector<1x8x16xf32>
    tpu.vector_store %arg9[%c0_33, %c0_34, %c16_35], %93 {strides = array<i32>} : memref<1x8x32xf32, #tpu.memory_space<vmem>>, vector<1x8x16xf32>,
    return
  }
  func.func @transform_0(%arg0: i32) -> (i32, i32, i32) {
    %c0_i32 = arith.constant 0 : i32
    %c0_i32_0 = arith.constant 0 : i32
    %c0_i32_1 = arith.constant 0 : i32
    return %arg0, %c0_i32, %c0_i32_0 : i32, i32, i32
  }
  func.func @transform_1(%arg0: i32) -> (i32, i32, i32) {
    %c0_i32 = arith.constant 0 : i32
    %c0_i32_0 = arith.constant 0 : i32
    %c0_i32_1 = arith.constant 0 : i32
    return %arg0, %c0_i32, %c0_i32_0 : i32, i32, i32
  }
  func.func @transform_2(%arg0: i32) -> (i32, i32, i32) {
    %c0_i32 = arith.constant 0 : i32
    %c0_i32_0 = arith.constant 0 : i32
    %c0_i32_1 = arith.constant 0 : i32
    return %arg0, %c0_i32, %c0_i32_0 : i32, i32, i32
  }
  func.func @transform_3(%arg0: i32) -> (i32, i32) {
    %c0_i32 = arith.constant 0 : i32
    %c0_i32_0 = arith.constant 0 : i32
    %c0_i32_1 = arith.constant 0 : i32
    return %c0_i32, %c0_i32_0 : i32, i32
  }
  func.func @transform_4(%arg0: i32) -> (i32, i32) {
    %c0_i32 = arith.constant 0 : i32
    %c0_i32_0 = arith.constant 0 : i32
    %c0_i32_1 = arith.constant 0 : i32
    return %c0_i32, %c0_i32_0 : i32, i32
  }
  func.func @transform_5(%arg0: i32) -> (i32, i32) {
    %c0_i32 = arith.constant 0 : i32
    %c0_i32_0 = arith.constant 0 : i32
    %c0_i32_1 = arith.constant 0 : i32
    return %c0_i32, %c0_i32_0 : i32, i32
  }
  func.func @transform_6(%arg0: i32) -> (i32, i32) {
    %c0_i32 = arith.constant 0 : i32
    %c0_i32_0 = arith.constant 0 : i32
    %c0_i32_1 = arith.constant 0 : i32
    return %c0_i32, %c0_i32_0 : i32, i32
  }
  func.func @transform_7(%arg0: i32) -> (i32, i32) {
    %c0_i32 = arith.constant 0 : i32
    %c0_i32_0 = arith.constant 0 : i32
    %c0_i32_1 = arith.constant 0 : i32
    return %c0_i32, %c0_i32_0 : i32, i32
  }
  func.func @transform_8(%arg0: i32) -> (i32, i32, i32) {
    %c0_i32 = arith.constant 0 : i32
    %c0_i32_0 = arith.constant 0 : i32
    %c0_i32_1 = arith.constant 0 : i32
    return %arg0, %c0_i32, %c0_i32_0 : i32, i32, i32
  }
}

</mosaic_0001>

<bundles_post_ra>
// kernel: tpu_custom_call.1
= control target key start
LH: loop header
LB: loop body
LE: loop exit
PB: predicated region body
PF: predicated region fallthrough
CT: control target
= control target key end

     0   :  { %13 = vsyncpa [#allocation3], 0  ;;  %s1354_s0 = inlined_call_operand.vmem [shape: s32[2,8,1], index: 0, kind: input, shape index: {}]   ;;  %s1355_s1 = inlined_call_operand.vmem [shape: s32[2,8,1], index: 1, kind: input, shape index: {}]   ;;  %s1356_s2 = inlined_call_operand.vmem [shape: f32[2,8,3], index: 2, kind: input, shape index: {}]   ;;  %s1357_s3 = inlined_call_operand.vmem [shape: f32[128,32], index: 3, kind: input, shape index: {}]   ;;  %s1358_s4 = inlined_call_operand.vmem [shape: f32[8,32], index: 4, kind: input, shape index: {}]   ;;  %s1359_s5 = inlined_call_operand.vmem [shape: f32[3,16], index: 5, kind: input, shape index: {}]   ;;  %s1360_s6 = inlined_call_operand.vmem [shape: f32[8,32], index: 6, kind: input, shape index: {}]   ;;  %s1361_s7 = inlined_call_operand.vmem [shape: f32[8,32], index: 7, kind: input, shape index: {}]   ;;  %s1362_s8 = inlined_call_operand.hbm [shape: f32[2,8,32], index: 8, kind: output, shape index: {}]  }
   0x1   :  { %15 = vsyncpa [#allocation3 + $0x1], 0  ;;  %s1123_s27 = smov 0   ;;  %s1125_s28 = smov 0  }
   0x2   :  { %s1127_s29 = smov 0   ;;  %s1129_s30 = smov 0  }
   0x3 LB: > { %s1144_s9 = sadd.s32 4294967295, %s1064_s30   ;;  %s913_s10 = sadd.s32 4294967294, %s1064_s30   ;;  %s1064_s30 = sphi %s1129_s30, %s1368_s30   ;;  %s1060_s29 = sphi %s1127_s29, %s1367_s29   ;;  %s1056_s28 = sphi %s1125_s28, %s1366_s28   ;;  %s1052_s27 = sphi %s1123_s27, %s1365_s27  }
   0x4   : > { %s1148_s11 = sadd.s32 1, %s1064_s30   ;;  %s211_s12 = sadd.s32 1, %s1060_s29 }
   0x5   : > { %s208_s13 = ssub.s32 %s1064_s30, %s1148_s11  ;;  %p221_p0 = scmp.ne.s32.totalorder %s1060_s29, %s1056_s28 }
   0x6   : > { %p209_p1 = scmp.eq.s32.totalorder %s208_s13, 0  ;;  %p222_p2 = scmp.eq.s32.totalorder %s1144_s9, 1 }
   0x7   : > { %p227_p3 = scmp.ne.s32.totalorder %s1056_s28, %s1052_s27  ;;  %p228_p4 = scmp.eq.s32.totalorder %s913_s10, 1 }
   0x8   : > { %s1159_s14 = scalar_select %p209_p1, %s1060_s29, %s211_s12  }
   0x9   : > { %p1161_p5 = por %p222_p2, %p221_p0  ;;  %p1165_p6 = por %p228_p4, %p227_p3 }
   0xa   : > { %p916_p7 = scmp.ge.s32.totalorder %s1064_s30, 1  ;;  %p282_p8 = scmp.lt.s32.totalorder %s1064_s30, 3 }
   0xc   : > { %p283_p9 = pnand %p916_p7, %p282_p8 }
   0xd   : > { %p323_p10 = scmp.lt.s32.totalorder (!%p283_p9), %s1144_s9, 1  ;;  %s1076_s23 = smov (!%p283_p9), 16  }
   0xe   : > { %286 = sbr.rel (%p283_p9) target bundleno = 729 (0x2d9), region = 52  ;;  %s320_s26 = sand.u32 (!%p283_p9), 1, %s1056_s28  }
  0x13   : > { %v366_v0 = vld [vmem:[%s1357_s3 + $0x78] sm:$0xff]  ;;  %v1066_v1 = vmov 2   ;;  %v1067_v2 = vmov 0   ;;  %v365_v3 = vld [vmem:[%s1357_s3 + $0x70] sm:$0xff]  ;;  %s324_s21 = scalar_select %p323_p10, %s1144_s9, 1  ;;  %v364_v4 = vld [vmem:[%s1357_s3 + $0x68] sm:$0xff]  ;;  %v338_v25 = vlaneseq }
  0x14   : > { %996 = vset.pattern.permute.xlu1 %v1066_v1  ;;  %994 = vset.pattern.permute.xlu0 %v1067_v2  ;;  %v363_v5 = vld [vmem:[%s1357_s3 + $0x60] sm:$0xff]  ;;  %v362_v8 = vld [vmem:[%s1357_s3 + $0x58] sm:$0xff]  ;;  %v361_v10 = vld [vmem:[%s1357_s3 + $0x50] sm:$0xff]  ;;  %v1068_v14 = vmov 1   ;;  %v1069_v38 = vmov 1.0  }
  0x15   : > { %998 = vset.pattern.permute.xlu2 %v1067_v2  ;;  %367 = vmatpush.msra.mxu0 %v366_v0  ;;  %s918_s24 = sshll.u32 %s324_s21, 3  ;;  %v360_v11 = vld [vmem:[%s1357_s3 + $0x48] sm:$0xff]  ;;  %v359_v13 = vld [vmem:[%s1357_s3 + $0x40] sm:$0xff]  ;;  %v358_v15 = vld [vmem:[%s1357_s3 + $0x38] sm:$0xff]  ;;  %v339_v27 = vand.u32 127, %v338_v25 }
  0x16   : > { %s334_s10 = scalar_lea.vmem %s1356_s2, %s918_s24  ;;  %s330_s19 = scalar_lea.vmem %s1355_s1, %s918_s24  ;;  %v357_v16 = vld [vmem:[%s1357_s3 + $0x30] sm:$0xff]  ;;  %v356_v17 = vld [vmem:[%s1357_s3 + $0x28] sm:$0xff]  ;;  %v355_v18 = vld [vmem:[%s1357_s3 + $0x20] sm:$0xff]  ;;  %v1070_v51 = vmov 683565275  }
  0x17   : > { %368 = vmatpush.msra.mxu0 %v365_v3  ;;  %v387_v6 = vld [vmem:[%s334_s10] sm:$0xff]  ;;  %s326_s10 = scalar_lea.vmem %s1354_s0, %s918_s24  ;;  %v354_v19 = vld [vmem:[%s1357_s3 + $0x18] sm:$0xff]  ;;  %v353_v20 = vld [vmem:[%s1357_s3 + $0x10] sm:$0xff]  ;;  %v1071_v53 = vmov 2475754826  }
  0x18   : > { %404 = vperm.xlu1 %996, %v387_v6   ;;  %391 = vperm.xlu0 %994, %v387_v6   ;;  %v336_v7 = vld [vmem:[%s330_s19] sm:$0xff]  ;;  %v352_v21 = vld [vmem:[%s1357_s3 + $0x8] sm:$0xff]  ;;  %v1072_v56 = vmov 2131351028   ;;  %v1073_v59 = vmov 2102212464  }
  0x19   : > { %369 = vmatpush.msra.mxu0 %v364_v4  ;;  %v337_v9 = vadd.s32 16, %v336_v7  ;;  %v335_v12 = vld [vmem:[%s326_s10] sm:$0xff]  ;;  %v1074_v62 = vmov 920167782   ;;  %s1077_s10 = smov 112  }
  0x1a   : > { %v351_v22 = vld [vmem:[%s1357_s3] sm:$0xff] }
  0x1b   : > { %370 = vmatpush.msra.mxu0 %v363_v5  ;;  %345 = vperm.xlu2 %998, %v337_v9   ;;  %v388_v26 = vld [vmem:[%s1359_s5] sm:$0x7] }
  0x1c   : > { %v394_v29 = vperm.slane %v388_v26, 0  ;;  %v407_v30 = vperm.slane %v388_v26, 2  ;;  %v400_v31 = vperm.slane %v388_v26, 1 }
  0x1d   : > { %371 = vmatpush.msra.mxu0 %v362_v8 }
  0x1f   : > { %372 = vmatpush.msra.mxu0 %v361_v10 }
  0x20   : > { %997 = vset.pattern.permute.xlu1 %v1067_v2  ;;  %995 = vset.pattern.permute.xlu0 %v1068_v14 }
  0x21   : > { %373 = vmatpush.msra.mxu0 %v360_v11  ;;  %397 = vperm.xlu0 %995, %v387_v6  }
  0x22   : > { %341 = vperm.xlu1 %997, %v335_v12  }
  0x23   : > { %374 = vmatpush.msra.mxu0 %v359_v13 }
  0x25   : > { %375 = vmatpush.msra.mxu0 %v358_v15 }
  0x27   : > { %376 = vmatpush.msra.mxu0 %v357_v16 }
  0x29   : > { %999 = vset.pattern.permute.xlu0 %v1066_v1  ;;  %377 = vmatpush.msra.mxu0 %v356_v17  ;;  %v1075_v1 = vmov 1326507024  }
  0x2b   : > { %378 = vmatpush.msra.mxu0 %v355_v18 }
  0x2d   : > { %379 = vmatpush.msra.mxu0 %v354_v19 }
  0x2f   : > { %380 = vmatpush.msra.mxu0 %v353_v20 }
  0x31   : > { %381 = vmatpush.msra.mxu0 %v352_v21 }
  0x33   : > { %382 = vmatpush.msra.mxu0 %v351_v22 }
  0x75   : > { %v346_v28 = vpop.permute.xlu2 %345 }
  0x76   : > { %vm347_vm0 = vcmp.eq.s32.totalorder %v339_v27, %v346_v28 }
  0x8a   : > { %v392_v23 = vpop.permute.xlu0 %391  ;;  %v405_v24 = vpop.permute.xlu1 %404 }
  0x8b   : > { %v395_v34 = vmul.f32 %v394_v29, %v392_v23  ;;  %v408_v35 = vmul.f32 %v407_v30, %v405_v24 }
  0x93   : > { %v398_v32 = vpop.permute.xlu0 %397 }
  0x94   : > { %v342_v33 = vpop.permute.xlu1 %341  ;;  %v401_v36 = vmul.f32 %v400_v31, %v398_v32 }
  0x95   : > { %vm343_vm1 = vcmp.eq.s32.totalorder %v339_v27, %v342_v33 }
  0x96   : > { %vm348_vm2 = vmor %vm343_vm1, %vm347_vm0  ;;  %v402_v37 = vadd.f32 %v401_v36, %v395_v34 }
  0x97   : > { %922 = vmatmul.msk.f32.vlgmr.msra.gmra.mxu0 %vm348_vm2, %v1069_v38 }
  0x98   : > { %v1236_v39 = vadd.f32 %v408_v35, %v402_v37 }
  0x9a   : > { %v415_v40 = vand.u32 2139095040, %v1236_v39  ;;  %v412_v43 = vand.u32 2147483647, %v1236_v39  ;;  %vm414_vm15 = vcmp.lt.s32.totalorder %v1236_v39, 0 }
  0x9c   : > { %v416_v41 = vshrl.u32 %v415_v40, 23  ;;  %v419_v46 = vand.u32 8388607, %v412_v43  ;;  %vm413_vm0 = vcmp.le.f32.partialorder %v412_v43, 0.7853982 }
  0x9e   : > { %v923_v42 = vadd.s32 4294967169, %v416_v41  ;;  %v420_v50 = vor.u32 8388608, %v419_v46 }
  0xa0   : > { %v422_v44 = vadd.s32 1, %v923_v42  ;;  %v1253_v9 = vshll.u32 %v420_v50, 8 }
  0xa2   : > { %vm423_vm3 = vcmp.gt.s32.totalorder %v422_v44, 0  ;;  %v461_v18 = vand.u32 65535, %v1253_v9  ;;  %v462_v19 = vshrl.u32 %v1253_v9, 16 }
  0xa3   : > { %v424_v45 = vsel %vm423_vm3, %v422_v44, 0 }
  0xa4   : > { %v426_v47 = vand.u32 31, %v424_v45  ;;  %v1244_v49 = vshrl.u32 %v424_v45, 5 }
  0xa6   : > { %v1242_v48 = vsub.s32 32, %v426_v47  ;;  %v429_v52 = vshll.u32 %v1070_v51, %v426_v47  ;;  %v432_v54 = vshll.u32 %v1071_v53, %v426_v47  ;;  %v435_v58 = vshll.u32 %v1072_v56, %v426_v47 }
  0xa7   : > { %v438_v61 = vshll.u32 %v1073_v59, %v426_v47  ;;  %v441_v0 = vshll.u32 %v1074_v62, %v426_v47  ;;  %vm444_vm4 = vcmp.lt.s32.totalorder %v1244_v49, 1  ;;  %vm447_vm5 = vcmp.lt.s32.totalorder %v1244_v49, 4 }
  0xa8   : > { %v430_v55 = vshrl.u32 %v1071_v53, %v1242_v48  ;;  %v433_v57 = vshrl.u32 %v1072_v56, %v1242_v48  ;;  %v436_v60 = vshrl.u32 %v1073_v59, %v1242_v48  ;;  %v439_v63 = vshrl.u32 %v1074_v62, %v1242_v48 }
  0xa9   : > { %v442_v3 = vshrl.u32 %v1075_v1, %v1242_v48  ;;  %vm446_vm6 = vcmp.lt.s32.totalorder %v1244_v49, 3  ;;  %vm445_vm7 = vcmp.lt.s32.totalorder %v1244_v49, 2  ;;  %v428_v46 = vshrl.u32 %v1070_v51, %v1242_v48 }
  0xaa   : > { %v431_v4 = vor.u32 %v430_v55, %v429_v52  ;;  %v434_v5 = vor.u32 %v433_v57, %v432_v54  ;;  %v437_v6 = vor.u32 %v436_v60, %v435_v58  ;;  %v440_v7 = vor.u32 %v439_v63, %v438_v61 }
  0xab   : > { %v443_v8 = vor.u32 %v442_v3, %v441_v0 }
  0xac   : > { %v452_v10 = vsel %vm444_vm4, %v431_v4, %v434_v5  ;;  %v456_v11 = vsel %vm444_vm4, %v434_v5, %v437_v6  ;;  %v453_v12 = vsel %vm447_vm5, %v440_v7, 920167782  ;;  %v449_v42 = vsel %vm447_vm5, %v437_v6, 2102212464 }
  0xad   : > { %v457_v13 = vsel %vm447_vm5, %v443_v8, 1326507024  ;;  %v454_v14 = vsel %vm446_vm6, %v437_v6, %v453_v12  ;;  %v448_v55 = vsel %vm444_vm4, %v428_v46, %v431_v4  ;;  %v450_v56 = vsel %vm446_vm6, %v434_v5, %v449_v42 }
  0xae   : > { %v458_v15 = vsel %vm446_vm6, %v440_v7, %v457_v13  ;;  %v455_v16 = vsel %vm445_vm7, %v452_v10, %v454_v14  ;;  %v451_v48 = vsel %vm445_vm7, %v448_v55, %v450_v56  ;;  %vm555_vm4 = vweird.f32 %v1236_v39 }
  0xaf   : > { %v459_v17 = vsel %vm445_vm7, %v456_v11, %v458_v15  ;;  %v485_v22 = vand.u32 65535, %v455_v16  ;;  %v486_v23 = vshrl.u32 %v455_v16, 16  ;;  %v505_v63 = vmul.u32 %v1253_v9, %v451_v48 }
  0xb0   : > { %v463_v20 = vand.u32 65535, %v459_v17  ;;  %v464_v21 = vshrl.u32 %v459_v17, 16 }
  0xb1   : > { %v488_v26 = vmul.u32 %v486_v23, %v461_v18  ;;  %v489_v27 = vmul.u32 %v485_v22, %v462_v19  ;;  %v487_v31 = vmul.u32 %v485_v22, %v461_v18  ;;  %v490_v35 = vmul.u32 %v486_v23, %v462_v19 }
  0xb2   : > { %v466_v24 = vmul.u32 %v464_v21, %v461_v18  ;;  %v467_v25 = vmul.u32 %v463_v20, %v462_v19  ;;  %v465_v28 = vmul.u32 %v463_v20, %v461_v18  ;;  %v468_v30 = vmul.u32 %v464_v21, %v462_v19 }
  0xb3   : > { %v491_v32 = vshll.u32 %v488_v26, 16  ;;  %v493_v37 = vshll.u32 %v489_v27, 16  ;;  %v492_v53 = vshrl.u32 %v488_v26, 16  ;;  %v494_v59 = vshrl.u32 %v489_v27, 16 }
  0xb4   : > { %v469_v29 = vshll.u32 %v466_v24, 16  ;;  %v471_v33 = vshll.u32 %v467_v25, 16  ;;  %v470_v47 = vshrl.u32 %v466_v24, 16  ;;  %v472_v57 = vshrl.u32 %v467_v25, 16 }
  0xb5   : > { %vm495_vm9 = vc.u32 %v487_v31, %v491_v32  ;;  %v497_v38 = vadd.s32 %v491_v32, %v487_v31 }
  0xb6   : > { %vm473_vm8 = vc.u32 %v465_v28, %v469_v29  ;;  %v475_v34 = vadd.s32 %v469_v29, %v465_v28  ;;  %v496_v41 = vsel %vm495_vm9, 1, %v1067_v2 }
  0xb7   : > { %v474_v36 = vsel %vm473_vm8, 1, %v1067_v2  ;;  %v498_v45 = vadd.s32 %v496_v41, %v490_v35  ;;  %vm499_vm11 = vc.u32 %v497_v38, %v493_v37  ;;  %v501_v62 = vadd.s32 %v497_v38, %v493_v37 }
  0xb8   : > { %v476_v40 = vadd.s32 %v474_v36, %v468_v30  ;;  %vm477_vm10 = vc.u32 %v475_v34, %v471_v33  ;;  %v500_v52 = vsel %vm499_vm11, 1, %v1067_v2  ;;  %vm727_vm8 = vcmask 130048  }
  0xb9   : > { %v478_v44 = vsel %vm477_vm10, 1, %v1067_v2  ;;  %v502_v54 = vadd.s32 %v500_v52, %v498_v45 }
  0xba   : > { %v480_v50 = vadd.s32 %v478_v44, %v476_v40 }
  0xbb   : > { %v503_v60 = vadd.s32 %v502_v54, %v492_v53 }
  0xbc   : > { %v481_v58 = vadd.s32 %v480_v50, %v470_v47 }
  0xbd   : > { %v504_v51 = vadd.s32 %v503_v60, %v494_v59 }
  0xbe   : > { %v482_v61 = vadd.s32 %v481_v58, %v472_v57  ;;  %v410_v57 = vld [vmem:[%s1358_s4] sm:$0xff] }
  0xbf   : > { %v508_v2 = vadd.s32 1, %v504_v51 }
  0xc0   : > { %vm507_vm12 = vc.u32 %v482_v61, %v501_v62  ;;  %v506_v49 = vadd.s32 %v501_v62, %v482_v61 }
  0xc1   : > { %v509_v0 = vsel %vm507_vm12, %v508_v2, %v504_v51  ;;  %vm812_vm12 = vcmask 261248  }
  0xc2   : > { %v510_v1 = vadd.s32 %v509_v0, %v505_v63 }
  0xc4   : > { %v511_v3 = vadd.s32 536870912, %v510_v1 }
  0xc6   : > { %v512_v4 = vshrl.u32 %v511_v3, 30 }
  0xc8   : > { %v513_v6 = vshll.u32 %v512_v4, 30  ;;  %v536_v25 = vsub.s32 4, %v512_v4 }
  0xca   : > { %v514_v5 = vsub.s32 %v510_v1, %v513_v6  ;;  %v537_v30 = vsel %vm414_vm15, %v536_v25, %v512_v4 }
  0xcb   : > { %v539_v33 = vsel %vm413_vm0, 0, %v537_v30 }
  0xcc   : > { %vm515_vm13 = vcmp.lt.s32.totalorder %v514_v5, 0  ;;  %v516_v7 = vsub.s32 0, %v514_v5  ;;  %v711_v38 = vadd.s32 3, %v539_v33  ;;  %v556_v55 = vand.u32 3, %v539_v33 }
  0xce   : > { %v517_v8 = vsel %vm515_vm13, %v516_v7, %v514_v5  ;;  %v712_v44 = vand.u32 3, %v711_v38  ;;  %vm558_vm5 = vcmp.eq.s32.totalorder %v556_v55, 0  ;;  %vm561_vm6 = vcmp.eq.s32.totalorder %v556_v55, 2 }
  0xcf   : > { %v518_v10 = vclz %v517_v8  ;;  %vm557_vm7 = vcmp.lt.s32.totalorder %v556_v55, 2 }
  0xd0   : > { %vm714_vm1 = vcmp.eq.s32.totalorder %v712_v44, 0  ;;  %vm717_vm2 = vcmp.eq.s32.totalorder %v712_v44, 2  ;;  %vm713_vm3 = vcmp.lt.s32.totalorder %v712_v44, 2 }
  0xd1   : > { %v924_v11 = vadd.s32 4294967294, %v518_v10 }
  0xd3   : > { %vm925_vm14 = vcmp.lt.s32.totalorder %v924_v11, 0 }
  0xd4   : > { %v521_v12 = vsel %vm925_vm14, 0, %v924_v11 }
  0xd5   : > { %v522_v13 = vsub.s32 32, %v521_v12  ;;  %v526_v14 = vsub.s32 4294967266, %v521_v12  ;;  %v523_v15 = vshll.u32 %v514_v5, %v521_v12 }
  0xd7   : > { %v524_v16 = vshrl.u32 %v506_v49, %v522_v13  ;;  %v527_v17 = vadd.s32 127, %v526_v14 }
  0xd9   : > { %v525_v9 = vor.u32 %v524_v16, %v523_v15  ;;  %v528_v18 = vshll.u32 %v527_v17, 23 }
  0xdb   : > { %v529_v19 = vor.u32 4788187, %v528_v18  ;;  %v532_v21 = vcvt.s32.f32 %v525_v9 }
  0xdd   : > { %v530_v20 = vand.u32 2147483647, %v529_v19 }
  0xdf   : > { %v533_v22 = vmul.f32 %v532_v21, %v530_v20 }
  0xe1   : > { %v534_v23 = vxor.u32 2147483648, %v533_v22 }
  0xe3   : > { %v535_v24 = vsel %vm414_vm15, %v534_v23, %v533_v22 }
  0xe4   : > { %v538_v26 = vsel %vm413_vm0, %v1236_v39, %v535_v24 }
  0xe5   : > { %v540_v27 = vmul.f32 %v538_v26, %v538_v26 }
  0xe7   : > { %v541_v28 = vmul.f32 -0.001358992, %v540_v27  ;;  %v548_v29 = vmul.f32 -0.00019511016, %v540_v27 }
  0xe9   : > { %v542_v31 = vadd.f32 0.041655596, %v541_v28  ;;  %v549_v32 = vadd.f32 0.008332121, %v548_v29 }
  0xeb   : > { %v543_v34 = vmul.f32 %v542_v31, %v540_v27  ;;  %v550_v35 = vmul.f32 %v549_v32, %v540_v27 }
  0xed   : > { %v544_v36 = vadd.f32 -0.4999988, %v543_v34  ;;  %v551_v37 = vadd.f32 -0.16666654, %v550_v35 }
  0xef   : > { %v545_v40 = vmul.f32 %v544_v36, %v540_v27  ;;  %v552_v41 = vmul.f32 %v551_v37, %v540_v27 }
  0xf1   : > { %v546_v42 = vadd.f32 1.0, %v545_v40  ;;  %v553_v43 = vadd.f32 1.0, %v552_v41 }
  0xf3   : > { %v554_v45 = vmul.f32 %v553_v43, %v538_v26  ;;  %v562_v46 = vxor.u32 2147483648, %v546_v42 }
  0xf5   : > { %v559_v47 = vxor.u32 2147483648, %v554_v45  ;;  %v719_v52 = vsel %vm717_vm2, %v562_v46, %v554_v45  ;;  %v563_v58 = vsel %vm561_vm6, %v562_v46, %v554_v45 }
  0xf7   : > { %v716_v50 = vsel %vm714_vm1, %v546_v42, %v559_v47  ;;  %v560_v56 = vsel %vm558_vm5, %v546_v42, %v559_v47  ;;  %v801_v47 = vld [vmem:[%s1360_s6] sm:$0xff] }
  0xf8   : > { %v720_v53 = vsel %vm713_vm3, %v716_v50, %v719_v52  ;;  %v564_v59 = vsel %vm557_vm7, %v560_v56, %v563_v58 }
  0xf9   : > { %v721_v54 = vsel %vm555_vm4, nan, %v720_v53  ;;  %v565_v62 = vsel %vm555_vm4, nan, %v564_v59  ;;  %v803_v53 = vld [vmem:[%s1361_s7] sm:$0xff] }
  0xfa   : > { %723 = vrot.lane.b32.xlu2 %v721_v54, %s1076_s23 }
 0x114   : > { %v384_v60 = vpop.f32.mrf.mxu0 }
 0x115   : > { %v411_v61 = vadd.f32 %v410_v57, %v384_v60 }
 0x117   : > { %v1299_v39 = vadd.f32 %v565_v62, %v411_v61 }
 0x119   : > { %v728_v48 = vsel %vm727_vm8, %v1299_v39, 0.0  ;;  %v753_v0 = vmul.f32 %v1299_v39, %v1299_v39 }
 0x11a   : > { %729 = vadd.xlane.f32.xlu0 %v728_v48 }
 0x11b   : > { %v754_v1 = vsel %vm727_vm8, %v753_v0, 0.0 }
 0x154   : > { %v724_v51 = vpop.permute.xlu2 %723 }
 0x155   : > { %v1303_v2 = vadd.f32 %v724_v51, %v411_v61 }
 0x157   : > { %739 = vrot.lane.b32.xlu1 %v1303_v2, %s1077_s10  ;;  %v764_v63 = vmul.f32 %v1303_v2, %v1303_v2 }
 0x159   : > { %766 = vrot.lane.b32.xlu2 %v764_v63, %s1077_s10  ;;  %s917_s10 = sshll.u32 %s320_s26, 3 }
 0x182   : > { %755 = vadd.xlane.f32.xlu2 %v754_v1 }
 0x18d   : > { %v730_v3 = vpop.xlane.xlu0 %729 }
 0x18e   : > { %v731_v4 = vrot.slane %v730_v3, 4 }
 0x190   : > { %v732_v6 = vadd.f32 %v731_v4, %v730_v3 }
 0x192   : > { %v733_v5 = vrot.slane %v732_v6, 2 }
 0x194   : > { %v734_v7 = vadd.f32 %v733_v5, %v732_v6 }
 0x196   : > { %v735_v8 = vrot.slane %v734_v7, 1 }
 0x198   : > { %v736_v10 = vadd.f32 %v735_v8, %v734_v7 }
 0x19a   : > { %933 = vpush %v736_v10 }
 0x1b3   : > { %v767_v11 = vpop.permute.xlu2 %766 }
 0x1b4   : > { %v769_v12 = vsel %vm727_vm8, %v767_v11, 0.0 }
 0x1b5   : > { %770 = vadd.xlane.f32.xlu2 %v769_v12 }
 0x1c9   : > { %v740_v49 = vpop.permute.xlu1 %739 }
 0x1ca   : > { %v742_v13 = vsel %vm727_vm8, %v740_v49, 0.0 }
 0x1cb   : > { %743 = vadd.xlane.f32.xlu1 %v742_v13  ;;  %s934_s12 = spop %933 }
 0x1f5   : > { %v756_v14 = vpop.xlane.xlu2 %755 }
 0x1f6   : > { %v757_v16 = vrot.slane %v756_v14, 4 }
 0x1f8   : > { %v758_v9 = vadd.f32 %v757_v16, %v756_v14 }
 0x1fa   : > { %v759_v19 = vrot.slane %v758_v9, 2 }
 0x1fc   : > { %v760_v24 = vadd.f32 %v759_v19, %v758_v9 }
 0x1fe   : > { %v761_v28 = vrot.slane %v760_v24, 1 }
 0x200   : > { %v762_v32 = vadd.f32 %v761_v28, %v760_v24 }
 0x228   : > { %v771_v15 = vpop.xlane.xlu2 %770 }
 0x229   : > { %v772_v17 = vrot.slane %v771_v15, 4 }
 0x22b   : > { %v773_v18 = vadd.f32 %v772_v17, %v771_v15 }
 0x22d   : > { %v774_v21 = vrot.slane %v773_v18, 2 }
 0x22f   : > { %v775_v25 = vadd.f32 %v774_v21, %v773_v18 }
 0x231   : > { %v776_v30 = vrot.slane %v775_v25, 1 }
 0x233   : > { %v777_v33 = vadd.f32 %v776_v30, %v775_v25 }
 0x23e   : > { %v744_v20 = vpop.xlane.xlu1 %743 }
 0x23f   : > { %v745_v22 = vrot.slane %v744_v20, 4 }
 0x241   : > { %v746_v23 = vadd.f32 %v745_v22, %v744_v20 }
 0x243   : > { %v747_v26 = vrot.slane %v746_v23, 2 }
 0x245   : > { %v748_v27 = vadd.f32 %v747_v26, %v746_v23 }
 0x247   : > { %v749_v29 = vrot.slane %v748_v27, 1 }
 0x249   : > { %v750_v31 = vadd.f32 %v749_v29, %v748_v27 }
 0x24b   : > { %935 = vpush %v750_v31 }
 0x24c   : > { %937 = vpush %v762_v32 }
 0x24d   : > { %939 = vpush %v777_v33 }
 0x27c   : > { %s936_s13 = spop %935 }
 0x27d   : > { %s752_s17 = sadd.f32 %s936_s13, %s934_s12  ;;  %s938_s18 = spop %937 }
 0x27e   : > { %s940_s24 = spop %939  ;;  %s930_s12 = sshll.u32 %s1144_s9, 3 }
 0x27f   : > { %s780_s19 = smul.f32 0.00390625, %s752_s17  ;;  %s779_s20 = sadd.f32 %s940_s24, %s938_s18 }
 0x280   : > { %s322_s9 = scalar_lea.vmem [#allocation2], %s917_s10  ;;  %s1022_s24 = scalar_lea.hbm %s1362_s8, 16 }
 0x281   : > { %s782_s21 = smul.f32 %s780_s19, %s780_s19  ;;  %v797_v43 = vstv %s780_s19 }
 0x282   : > { %s781_s22 = smul.f32 0.00390625, %s779_s20  ;;  %v798_v44 = vsub.f32 %v1299_v39, %v797_v43  ;;  %v806_v45 = vsub.f32 %v1303_v2, %v797_v43 }
 0x284   : > { %s783_s23 = ssub.f32 %s781_s22, %s782_s21  ;;  %s825_s21 = scalar_lea.hbm %s1362_s8, %s930_s12 }
 0x285   : > { %s815_s12 = scalar_lea.sflag [#allocation3], %s320_s26 }
 0x286   : > { %s784_s25 = sadd.f32 1e-05, %s783_s23  ;;  %s827_s23 = sshll.u32 %s322_s9, 4  ;;  %s828_s23 = int_to_ptr.vmem [resolvable:$true] %s827_s23 }
 0x288   : > { %v785_v34 = vstv %s784_s25  ;;  %s829_s25 = sshll.u32 %s825_s21, 4  ;;  %s830_s25 = int_to_ptr.hbm [resolvable:$true] %s829_s25 }
 0x289   : > { %1000 = vrsqrt.f32 %v785_v34  ;;  %vm792_vm10 = vweird.f32 %v785_v34 }
 0x28f   : > { %v1001_v35 = vpop.eup %1000 }
 0x290   : > { %v787_v36 = vmul.f32 %v1001_v35, %v785_v34  ;;  %vm793_vm9 = vweird.f32 %v1001_v35 }
 0x291   : > { %vm794_vm11 = vmor %vm792_vm10, %vm793_vm9 }
 0x292   : > { %v788_v37 = vmul.f32 %v1001_v35, %v787_v36 }
 0x294   : > { %v789_v38 = vmul.f32 0.5, %v788_v37 }
 0x296   : > { %v790_v40 = vsub.f32 1.5, %v789_v38 }
 0x298   : > { %v791_v41 = vmul.f32 %v1001_v35, %v790_v40 }
 0x29a   : > { %v795_v42 = vsel %vm794_vm11, %v1001_v35, %v791_v41 }
 0x29b   : > { %941 = vpush %v795_v42 }
 0x2cc   : > { %s942_s13 = spop %941 }
 0x2cd   : > { %v799_v46 = vstv %s942_s13  ;;  %s1016_s13 = sshra.s32 %s830_s25, 4  ;;  %s1017_s13 = int_to_ptr.hbm [resolvable:$true] %s1016_s13 }
 0x2ce   : > { %v800_v50 = vmul.f32 %v799_v46, %v798_v44  ;;  %v807_v52 = vmul.f32 %v806_v45, %v799_v46  ;;  %s1018_s17 = scalar_lea.hbm %s1017_s13, 8  ;;  %p1023_p0 = scmp.lt.s32.totalorder %s1017_s13, %s1362_s8 }
 0x2cf   : > { %p1019_p11 = scmp.ne.s32.totalorder %s1017_s13, %s1018_s17  ;;  %p1024_p1 = scmp.lt.s32.totalorder %s1022_s24, %s1018_s17 }
 0x2d0   : > { %v802_v54 = vmul.f32 %v801_v47, %v800_v50  ;;  %v809_v55 = vmul.f32 %v807_v52, %v801_v47 }
 0x2d1   : > { %p1020_p12 = pnand %p1019_p11, %p1161_p5  ;;  %p1025_p2 = por %p1024_p1, %p1023_p0 }
 0x2d2   : > { %v804_v56 = vadd.f32 %v803_v53, %v802_v54  ;;  %v811_v57 = vadd.f32 %v809_v55, %v803_v53 }
 0x2d3   : > { %p1021_p13 = pneg %p1020_p12 }
 0x2d4   : > { %805 = vst.msk [vmem:[%s322_s9] sm:$0xff] %vm727_vm8, %v804_v56 }
 0x2d5   : > { %813 = vst.msk [vmem:[%s322_s9] sm:$0xff] %vm812_vm12, %v811_v57  ;;  %p1026_p3 = pnand %p1025_p2, %p1021_p13 }
 0x2d7   : > { %1029 = shalt.err (!%p1026_p3)
}
 0x2d8   : > { %943 = dma.vmem_to_hbm [thread:$0]  (%p1161_p5), %s828_s23, 128, %s830_s25, %s815_s12  }
 0x2d9 PF: > { %p949_p4 = scmp.ge.s32.totalorder %s1064_s30, 2  ;;  %s841_s26 = sand.u32 1, %s1052_s27  }
 0x2da   : > { %s842_s22 = scalar_lea.sflag [#allocation3], %s841_s26 }
 0x2db   : > { %p946_p7 = pnand %p949_p4, %p1165_p6 }
 0x2dd   : > { %p947_p8 = pneg %p946_p7 }
 0x2df   : > { %1047 = dma.done.wait (%p947_p8), %s842_s22, 128  }
 0x2e0   : > { %1049 = vsyncadd (%p947_p8), %s842_s22, 4294967168  ;;  %p18_p9 = scmp.ge.s32.totalorder %s1148_s11, 4   ;;  %s1365_s27 = smov %s1056_s28 }
 0x2e1   : > { %s1366_s28 = smov %s1060_s29  ;;  %s1367_s29 = smov %s1159_s14 }
 0x2e2   : > { %s1368_s30 = smov %s1148_s11  ;;  %20 = sbr.rel (!%p18_p9) target bundleno = 3 (0x3), region = 93 }
 0x2e7   :  { %848 = vsyncpa [#allocation3], 1 }
 0x2e8   :  { %850 = vsyncpa [#allocation3 + $0x1], 1 }

</bundles_post_ra>
